<compile_context>
chip_gen: v7x
topology: tpu7x:2x2x1
jax: 0.10.0
libtpu: 0.0.40
codegen_flags: <defaults>
</compile_context>

<pallas_src>
import math

import jax
import jax.numpy as jnp
from jax.experimental import pallas as pl
from jax.experimental.pallas import tpu as pltpu


def _layer_scale_kernel(x_ref, gamma_ref, o_ref):
    # x_ref: (TR, TC) tile, gamma_ref: (1, TC) row -> broadcast multiply (VPU).
    o_ref[...] = x_ref[...] * gamma_ref[...]


def _sublane_multiple(dtype) -> int:
    # (8, 128) tiling: 8 sublanes for 4-byte, 16 for 2-byte, 32 for 1-byte dtypes.
    itemsize = jnp.dtype(dtype).itemsize
    return max(8, 32 // itemsize)


def _vmem_limit_bytes() -> int:
    # Generation-gate the scoped-VMEM cap: v5e/v6e have 128 MiB physical VMEM
    # (allow 64 MiB), v7x has 64 MiB per TensorCore (stay at 32 MiB).
    try:
        cap = getattr(pltpu.get_tpu_info(), "vmem_capacity_bytes", 0)
    except Exception:
        cap = 0
    if cap >= 128 * 1024 * 1024:
        return 64 * 1024 * 1024
    return 32 * 1024 * 1024


def _layer_scale_2d(x2d, gamma_row):
    """x2d: (R_rows, Dw) with Dw a multiple of 128; gamma_row: (1, Dw)."""
    R_rows, Dw = x2d.shape
    dtype = x2d.dtype
    itemsize = jnp.dtype(dtype).itemsize
    sub = _sublane_multiple(dtype)
    vmem_limit = _vmem_limit_bytes()

    # --- Column tiling guard: if even a minimal (sub, Dw) tile is too big for
    # comfortable double-buffering, tile the feature axis too (lane-dense 8192
    # column tiles). Otherwise keep the full feature width in one block.
    if sub * Dw * itemsize > vmem_limit // 8:
        tc = min(Dw, 8192)          # multiple of 128
    else:
        tc = Dw                     # full-extent (Dw is a multiple of 128)

    # --- Row tile: ~4 MiB per x tile => ~16 MiB double-buffered in+out. ---
    target_bytes = 4 * 1024 * 1024
    tr = max(sub, (target_bytes // max(1, tc * itemsize)) // sub * sub)

    if R_rows <= sub:
        tr = R_rows                 # full-extent row block (single tiny tile)
    else:
        n_sub = pl.cdiv(R_rows, sub)
        tr_units = max(1, min(tr // sub, n_sub))
        # Keep >= ~4 grid steps (2 per TensorCore) so v7x megacore splits work.
        tr_units = min(tr_units, max(1, pl.cdiv(n_sub, 4)))
        tr = tr_units * sub         # multiple of sub; partial last tile masked

    grid = (pl.cdiv(R_rows, tr), pl.cdiv(Dw, tc))

    return pl.pallas_call(
        _layer_scale_kernel,
        out_shape=jax.ShapeDtypeStruct((R_rows, Dw), dtype),
        grid=grid,
        in_specs=[
            pl.BlockSpec((tr, tc), lambda i, j: (i, j)),   # streamed x tiles
            pl.BlockSpec((1, tc), lambda i, j: (0, j)),    # gamma row (resident)
        ],
        out_specs=pl.BlockSpec((tr, tc), lambda i, j: (i, j)),
        compiler_params=pltpu.CompilerParams(
            dimension_semantics=("parallel", "parallel"),  # megacore-shardable
            vmem_limit_bytes=vmem_limit,
        ),
    )(x2d, gamma_row)


def layer_scale(x, gamma):
    """x: (..., D), gamma: (D,). Returns x * gamma (broadcast on last axis)."""
    orig_shape = x.shape
    D = orig_shape[-1]
    gamma = gamma.astype(x.dtype)

    x2d = x.reshape(-1, D)
    R = x2d.shape[0]
    if R == 0 or D == 0:
        return (x2d * gamma[None, :]).reshape(orig_shape)

    if D % 128 == 0:
        # Already lane-dense: no folding needed.
        out2d = _layer_scale_2d(x2d, gamma.reshape(1, D))
    else:
        # Fold k rows together so the kernel's last dim is a multiple of 128
        # (full-width vst, no masked lane-sparse stores).
        k = math.lcm(D, 128) // D
        Dw = k * D
        R_main = (R // k) * k
        parts = []
        if R_main > 0:
            x_main = x2d[:R_main].reshape(R_main // k, Dw)
            gamma_row = jnp.tile(gamma, k).reshape(1, Dw)
            parts.append(_layer_scale_2d(x_main, gamma_row).reshape(R_main, D))
        if R_main < R:
            # Tiny ragged remainder (< k rows): plain XLA multiply, no kernel.
            parts.append(x2d[R_main:] * gamma[None, :])
        out2d = parts[0] if len(parts) == 1 else jnp.concatenate(parts, axis=0)

    return out2d.reshape(orig_shape)


if __name__ == "__main__":
    key = jax.random.PRNGKey(0)
    init_values = 1e-5

    # Main check: (B, S, D) = (2, 8, 32) — matches the module's last-axis dim.
    B, S, D = 2, 8, 32
    x = jax.random.normal(key, (B, S, D), dtype=jnp.float32)
    gamma = init_values * jnp.ones((D,), dtype=jnp.float32)  # init_values * ones(dim)

    y = layer_scale(x, gamma)
    y = jax.block_until_ready(y)
    ref = x * gamma
    assert y.shape == x.shape
    assert jnp.allclose(y, ref, atol=1e-7), "mismatch vs reference"

    # Second check: ragged row count (R % k != 0) exercises the main+tail split.
    x2 = jax.random.normal(jax.random.PRNGKey(1), (3, 5, D), dtype=jnp.float32)
    y2 = jax.block_until_ready(layer_scale(x2, gamma))
    assert y2.shape == x2.shape
    assert jnp.allclose(y2, x2 * gamma, atol=1e-7), "mismatch vs reference (ragged)"

    print("KERNEL_OK")
</pallas_src>

<mosaic_0001>
module attributes {stable_mosaic.version = 11 : i64} {
  func.func @_layer_scale_kernel(%arg0: i32, %arg1: i32, %arg2: memref<4x128xf32, #tpu.memory_space<vmem>>, %arg3: memref<1x128xf32, #tpu.memory_space<vmem>>, %arg4: memref<4x128xf32, #tpu.memory_space<vmem>>) attributes {dimension_semantics = [#tpu.dimension_semantics<parallel>, #tpu.dimension_semantics<parallel>], iteration_bounds = array<i64: 1, 1>, scalar_prefetch = 0 : i64, scratch_operands = 0 : i64, tpu.core_type = #tpu.core_type<tc>, window_params = [{transform_indices = @transform_0, window_bounds = array<i64: 4, 128>}, {transform_indices = @transform_1, window_bounds = array<i64: 1, 128>}, {transform_indices = @transform_2, window_bounds = array<i64: 4, 128>}]} {
    %c0 = arith.constant 0 : index
    %c0_0 = arith.constant 0 : index
    %0 = vector.load %arg2[%c0, %c0_0] : memref<4x128xf32, #tpu.memory_space<vmem>>, vector<4x128xf32>
    %c0_1 = arith.constant 0 : index
    %c0_2 = arith.constant 0 : index
    %1 = vector.load %arg3[%c0_1, %c0_2] : memref<1x128xf32, #tpu.memory_space<vmem>>, vector<1x128xf32>
    %2 = vector.broadcast %1 : vector<1x128xf32> to vector<4x128xf32>
    %3 = arith.mulf %0, %2 : vector<4x128xf32>
    %c0_3 = arith.constant 0 : index
    %c0_4 = arith.constant 0 : index
    %4 = vector.load %arg4[%c0_3, %c0_4] : memref<4x128xf32, #tpu.memory_space<vmem>>, vector<4x128xf32>
    tpu.vector_store %arg4[%c0_3, %c0_4], %3 {strides = array<i32>} : memref<4x128xf32, #tpu.memory_space<vmem>>, vector<4x128xf32>,
    return
  }
  func.func @transform_0(%arg0: i32, %arg1: i32) -> (i32, i32) {
    %c0_i32 = arith.constant 0 : i32
    return %arg0, %arg1 : i32, i32
  }
  func.func @transform_1(%arg0: i32, %arg1: i32) -> (i32, i32) {
    %c0_i32 = arith.constant 0 : i32
    %c0_i32_0 = arith.constant 0 : i32
    return %c0_i32, %arg1 : i32, i32
  }
  func.func @transform_2(%arg0: i32, %arg1: i32) -> (i32, i32) {
    %c0_i32 = arith.constant 0 : i32
    return %arg0, %arg1 : i32, i32
  }
}

</mosaic_0001>

<bundles_post_ra>
// kernel: tpu_custom_call.1
= control target key start
LH: loop header
LB: loop body
LE: loop exit
PB: predicated region body
PF: predicated region fallthrough
CT: control target
= control target key end

     0   :  { %7 = vsyncpa [#allocation3], 0  ;;  %s144_s0 = inlined_call_operand.hbm [shape: f32[4,128], index: 0, kind: input, shape index: {}]   ;;  %s145_s1 = inlined_call_operand.vmem [shape: f32[1,128], index: 1, kind: input, shape index: {}]   ;;  %s146_s2 = inlined_call_operand.hbm [shape: f32[4,128], index: 2, kind: output, shape index: {}]  }
   0x1   :  { %8 = vsyncpa [#allocation4], 0  ;;  %s100_s9 = smov [#allocation2]   ;;  %s52_s13 = scalar_lea.hbm %s144_s0, 64 }
   0x2   :  { %s15_s10 = sshll.u32 %s100_s9, 4  ;;  %p53_p0 = scmp.ne.s32.totalorder %s144_s0, %s52_s13  ;;  %s16_s10 = int_to_ptr.vmem [resolvable:$true] %s15_s10 }
   0x3   :  { %p56_p1 = scmp.lt.u32.totalorder %s52_s13, %s144_s0 }
   0x5   :  { %p58_p2 = pnand %p56_p1, %p53_p0 }
   0x7   :  { %61 = shalt.err (!%p58_p2)
}
   0x8   :  { %s62_s18 = scalar_lea.vmem %s16_s10, 64  ;;  %p67_p4 = scmp.lt.s32.totalorder %s16_s10, %s16_s10 }
   0x9   :  { %p63_p3 = scmp.ne.s32.totalorder %s16_s10, %s62_s18  ;;  %p68_p5 = scmp.lt.s32.totalorder %s62_s18, %s62_s18 }
   0xb   :  { %p69_p6 = por %p68_p5, %p67_p4 }
   0xd   :  { %p70_p7 = pnand %p69_p6, %p63_p3 }
   0xf   :  { %73 = shalt.err (!%p70_p7)
}
  0x10   :  { %18 = dma.hbm_to_vmem [thread:$0]  %s144_s0, 64, %s16_s10, [#allocation3]  }
  0x11   :  { %96 = dma.done.wait [#allocation3], 64  }
  0x12   :  { %97 = vsyncadd [#allocation3], 4294967232  ;;  %s101_s21 = smov [#allocation5]   ;;  %v24_v0 = vld [vmem:[#allocation2] sm:$0xf] }
  0x13   :  { %s40_s22 = sshll.u32 %s101_s21, 4  ;;  %v49_v1 = vld [vmem:[%s145_s1] ss:$0 sm:$0xff]  ;;  %s41_s22 = int_to_ptr.vmem [resolvable:$true] %s40_s22 }
  0x14   :  { %v32_v2 = vmul.f32 %v49_v1, %v24_v0  ;;  %s74_s25 = scalar_lea.vmem %s41_s22, 64  ;;  %p79_p9 = scmp.lt.s32.totalorder %s41_s22, %s41_s22 }
  0x15   :  { %p75_p8 = scmp.ne.s32.totalorder %s41_s22, %s74_s25  ;;  %p80_p10 = scmp.lt.s32.totalorder %s74_s25, %s74_s25 }
  0x16   :  { %33 = vst [vmem:[#allocation5] sm:$0xf] %v32_v2 }
  0x17   :  { %p81_p11 = por %p80_p10, %p79_p9 }
  0x19   :  { %p82_p12 = pnand %p81_p11, %p75_p8 }
  0x1b   :  { %85 = shalt.err (!%p82_p12)
}
  0x1c   :  { %s86_s27 = scalar_lea.hbm %s146_s2, 64 }
  0x1d   :  { %p87_p13 = scmp.ne.s32.totalorder %s146_s2, %s86_s27  ;;  %p90_p0 = scmp.lt.u32.totalorder %s86_s27, %s146_s2 }
  0x1f   :  { %p92_p1 = pnand %p90_p0, %p87_p13 }
  0x21   :  { %95 = shalt.err (!%p92_p1)
}
  0x22   :  { %43 = dma.vmem_to_hbm [thread:$0]  %s41_s22, 64, %s146_s2, [#allocation4]  }
  0x23   :  { %98 = dma.done.wait [#allocation4], 64  }
  0x24   :  { %99 = vsyncadd [#allocation4], 4294967232 }
  0x25   :  { %47 = vsyncpa [#allocation3], 1 }
  0x26   :  { %48 = vsyncpa [#allocation4], 1 }

</bundles_post_ra>
